<compile_context>
chip_gen: v5e
topology: v5e:2x2
jax: 0.10.0
libtpu: 0.0.40
codegen_flags: <defaults>
</compile_context>

<pallas_src>
import functools

import jax
import jax.numpy as jnp
import numpy as np
from jax.experimental import pallas as pl
from jax.experimental.pallas import tpu as pltpu

# ----------------------------------------------------------------------------
# Lanczos lgamma (g=5, Numerical-Recipes 7-term set), shifted rational form:
#   lgamma(z) = 0.5*log(2*pi) + (z-0.5)*log(z+4.5) - (z+4.5) + log(A(z)),
#   A(z) = c0 + sum_{k=1..6} c_k/(z+k-1) = P(z)/Q(z),  Q(z) = z(z+1)...(z+5).
# Valid for z > 0 (all arguments in this loss are > 0).
# ----------------------------------------------------------------------------
_LGAMMA_COEF = (
    1.000000000190015,
    76.18009172947146,
    -86.50532032941677,
    24.01409824083091,
    -1.231739572450155,
    0.1208650973866179e-2,
    -0.5395239384953e-5,
)
_HALF_LOG_2PI = 0.5 * float(np.log(2.0 * np.pi))

# The rational part is only evaluated on min(z, _A_CLAMP); for z > 8192 the
# neglected variation of log(A) is < 1.6e-3 and it cancels between the x+1
# and x+disp arguments.  With the 2^-37 coefficient scale the product of
# three degree-6 polynomial values stays inside [~1e-36, ~1e37] in f32.
_A_CLAMP = 8192.0
_SER_SCALE = 2.0 ** -37


def _ser_rational_coeffs(scale=_SER_SCALE):
    """A(z) = P(z)/Q(z) coefficients (float64 precompute, common scale)."""
    q = np.poly1d([1.0])
    for j in range(6):
        q = q * np.poly1d([1.0, float(j)])            # Q(z) = z(z+1)...(z+5)
    p = _LGAMMA_COEF[0] * q
    for k in range(1, 7):
        term = np.poly1d([1.0])
        for j in range(6):
            if j != k - 1:
                term = term * np.poly1d([1.0, float(j)])
        p = p + _LGAMMA_COEF[k] * term
    p_c = tuple(float(c) * scale for c in np.asarray(p.coeffs))
    q_c = tuple(float(c) * scale for c in np.asarray(q.coeffs))
    return p_c, q_c


_SER_P, _SER_Q = _ser_rational_coeffs()


def _polyval(coeffs, z):
    """Horner evaluation (pure VPU madds), coeffs highest-degree first."""
    acc = jnp.full_like(z, coeffs[0])
    for c in coeffs[1:]:
        acc = acc * z + c
    return acc


# ----------------------------------------------------------------------------
# Kernel
# ----------------------------------------------------------------------------
def _zinb_kernel(x_ref, mean_ref, disp_ref, pi_ref, sf_ref, out_ref, *,
                 ridge_lambda, n_rows, n_cols, mask_rows, mask_cols):
    eps = 1e-12
    x = x_ref[...].astype(jnp.float32)
    disp = disp_ref[...].astype(jnp.float32)
    pi = pi_ref[...].astype(jnp.float32)
    sf = sf_ref[...].astype(jnp.float32)            # (TB, 1), lane-broadcast
    mean = mean_ref[...].astype(jnp.float32) * sf   # (TB, TG)

    de = disp + eps
    x1 = x + 1.0
    xd = x + de

    # Shared logs (also reused by t1 below through the algebraic split):
    #   log(1 + mean/(disp+eps)) == log(disp+mean+eps) - log(disp+eps)
    ld = jnp.log(de)                       # log(disp + eps)
    ldm = jnp.log(de + mean)               # log(disp + mean + eps)
    lmean = jnp.log(mean + eps)

    # ---- merged lgamma(de) + lgamma(x+1) - lgamma(x+de) ---------------------
    # "Stirling-like" main pieces: one log per argument (cannot merge, their
    # coefficients differ per element).
    main = ((de - 0.5) * jnp.log(de + 4.5)
            + (x + 0.5) * jnp.log(x + 5.5)
            - (xd - 0.5) * jnp.log(xd + 4.5)
            + (_HALF_LOG_2PI - 5.5))
    # Rational corrections merged into ONE log + ONE approx reciprocal.
    de_c = jnp.minimum(de, _A_CLAMP)
    x1_c = jnp.minimum(x1, _A_CLAMP)
    xd_c = jnp.minimum(xd, _A_CLAMP)
    num = (_polyval(_SER_P, de_c) * _polyval(_SER_P, x1_c)
           * _polyval(_SER_Q, xd_c))
    den = (_polyval(_SER_Q, de_c) * _polyval(_SER_Q, x1_c)
           * _polyval(_SER_P, xd_c))
    t1 = main + jnp.log(num * pl.reciprocal(den, approx=True))

    # ---- NB branch -----------------------------------------------------------
    t2 = (disp + x) * (ldm - ld) + x * (ld - lmean)
    nb_case = t1 + t2 - jnp.log(1.0 - pi + eps)

    # ---- zero-inflation branch ----------------------------------------------
    # torch.pow(disp/(disp+mean+eps), disp) with positive base, via shared logs.
    zero_nb = jnp.exp(disp * (ld - ldm))
    zero_case = -jnp.log(pi + (1.0 - pi) * zero_nb + eps)

    result = jnp.where(x <= 1e-08, zero_case, nb_case)
    if ridge_lambda > 0.0:
        result = result + ridge_lambda * (pi * pi)

    # ---- mask out-of-bounds rows/cols of boundary blocks (no wrapper pad) ---
    tb, tg = result.shape
    if mask_rows or mask_cols:
        valid = None
        if mask_rows:
            row = (pl.program_id(0) * tb
                   + jax.lax.broadcasted_iota(jnp.int32, (tb, tg), 0))
            valid = row < n_rows
        if mask_cols:
            col = (pl.program_id(1) * tg
                   + jax.lax.broadcasted_iota(jnp.int32, (tb, tg), 1))
            cvalid = col < n_cols
            valid = cvalid if valid is None else (valid & cvalid)
        result = jnp.where(valid, result, 0.0)

    # ---- lane-dense (8,128) partial-sum tile (pure VPU adds, full store) -----
    acc = result[:, 0:128]
    for g0 in range(128, tg, 128):
        acc = acc + result[:, g0:g0 + 128]
    acc = acc.reshape(tb // 8, 8, 128).sum(axis=0)
    out_ref[...] = acc


# ----------------------------------------------------------------------------
# Wrapper
# ----------------------------------------------------------------------------
_TARGET_BLOCK_BYTES = 2 * 1024 * 1024   # per dense-input block (f32)
_MAX_LANE_TILE = 1024
_MAX_SUBLANE_TILE = 1024
_MIN_GRID_CELLS = 8                     # give both v7x TensorCores work


def _round_up(v, m):
    return (v + m - 1) // m * m


def zinb_loss_pallas(x, mean, disp, pi, scale_factor, *, ridge_lambda=0.0):
    """ZINB loss. x/mean/disp/pi: [B, G]; scale_factor: [B, 1] (or [B])."""
    B, G = x.shape
    scale_factor = jnp.asarray(scale_factor).reshape(B, 1)

    # Tile selection: lane tile first, then batch tile to a ~2 MiB/input
    # budget.  Tiles never equal the raw (possibly huge / non-aligned) dims:
    # the grid is cdiv-based with in-kernel tail masking.
    TG = min(_round_up(G, 128), _MAX_LANE_TILE)
    tb_budget = max(8, (_TARGET_BLOCK_BYTES // (TG * 4)) // 8 * 8)
    TB = min(_round_up(B, 8), tb_budget, _MAX_SUBLANE_TILE)

    # Ensure enough grid cells for megacore sharding / pipelining.
    while pl.cdiv(B, TB) * pl.cdiv(G, TG) < _MIN_GRID_CELLS:
        if TB > 8:
            TB = max(8, _round_up(TB // 2, 8))
        elif TG > 128:
            TG = max(128, _round_up(TG // 2, 128))
        else:
            break

    grid = (pl.cdiv(B, TB), pl.cdiv(G, TG))
    mask_rows = (B % TB) != 0
    mask_cols = (G % TG) != 0

    kernel = functools.partial(
        _zinb_kernel,
        ridge_lambda=float(ridge_lambda),
        n_rows=B, n_cols=G,
        mask_rows=mask_rows, mask_cols=mask_cols)

    row_spec = pl.BlockSpec((TB, TG), lambda i, j: (i, j))
    sf_spec = pl.BlockSpec((TB, 1), lambda i, j: (i, 0))
    out_spec = pl.BlockSpec((8, 128), lambda i, j: (i, j))

    partials = pl.pallas_call(
        kernel,
        out_shape=jax.ShapeDtypeStruct((grid[0] * 8, grid[1] * 128),
                                       jnp.float32),
        grid_spec=pltpu.PrefetchScalarGridSpec(
            num_scalar_prefetch=0,
            grid=grid,
            in_specs=[row_spec, row_spec, row_spec, row_spec, sf_spec],
            out_specs=out_spec,
        ),
        compiler_params=pltpu.CompilerParams(
            dimension_semantics=("parallel", "parallel"),
            # 4 dense inputs x 2 buffers x <=2 MiB ~= 16 MiB; 32 MiB is safe
            # within the scoped limit on v5e/v6e and v7x (64 MiB physical).
            vmem_limit_bytes=32 * 1024 * 1024,
        ),
    )(x, mean, disp, pi, scale_factor)

    # Final reduction / mean outside the kernel (required for 'parallel' grid).
    return jnp.sum(partials) / jnp.float32(B * G)


# ----------------------------------------------------------------------------
# Pure-JAX reference mirroring the PyTorch forward.
# ----------------------------------------------------------------------------
def zinb_loss_ref(x, mean, disp, pi, scale_factor, ridge_lambda=0.0):
    eps = 1e-12
    mean = mean * scale_factor
    lg = jax.scipy.special.gammaln
    t1 = lg(disp + eps) + lg(x + 1.0) - lg(x + disp + eps)
    t2 = ((disp + x) * jnp.log(1.0 + mean / (disp + eps))
          + x * (jnp.log(disp + eps) - jnp.log(mean + eps)))
    nb_case = t1 + t2 - jnp.log(1.0 - pi + eps)
    zero_nb = jnp.power(disp / (disp + mean + eps), disp)
    zero_case = -jnp.log(pi + (1.0 - pi) * zero_nb + eps)
    result = jnp.where(x <= 1e-08, zero_case, nb_case)
    if ridge_lambda > 0.0:
        result = result + ridge_lambda * jnp.square(pi)
    return jnp.mean(result)


def _make_inputs(key, B, G):
    k1, k2, k3, k4, k5 = jax.random.split(key, 5)
    # Count-like data with plenty of zeros; positive mean/disp, pi in (0,1).
    x = jnp.floor(
        jnp.maximum(jax.random.normal(k1, (B, G)) * 3.0, 0.0)).astype(jnp.float32)
    mean = jax.nn.softplus(jax.random.normal(k2, (B, G))).astype(jnp.float32)
    disp = jax.nn.softplus(jax.random.normal(k3, (B, G))).astype(jnp.float32)
    pi = jax.nn.sigmoid(jax.random.normal(k4, (B, G))).astype(jnp.float32)
    sf = (1.0 + jax.nn.softplus(
        jax.random.normal(k5, (B, 1)))).astype(jnp.float32)
    return x, mean, disp, pi, sf


if __name__ == "__main__":
    key = jax.random.PRNGKey(0)
    kA, kB = jax.random.split(key)

    # Aligned shape.
    x, mean, disp, pi, sf = _make_inputs(kA, 16, 256)
    for rl in (0.0, 0.1):
        out = jax.block_until_ready(
            zinb_loss_pallas(x, mean, disp, pi, sf, ridge_lambda=rl))
        ref = zinb_loss_ref(x, mean, disp, pi, sf, ridge_lambda=rl)
        np.testing.assert_allclose(np.asarray(out), np.asarray(ref),
                                   rtol=5e-3, atol=5e-3)

    # Non-aligned shape (exercises the in-kernel boundary masking).
    x, mean, disp, pi, sf = _make_inputs(kB, 13, 200)
    out = jax.block_until_ready(
        zinb_loss_pallas(x, mean, disp, pi, sf, ridge_lambda=0.05))
    ref = zinb_loss_ref(x, mean, disp, pi, sf, ridge_lambda=0.05)
    np.testing.assert_allclose(np.asarray(out), np.asarray(ref),
                               rtol=5e-3, atol=5e-3)

    print("KERNEL_OK")
</pallas_src>

<mosaic_0001>
module attributes {stable_mosaic.version = 11 : i64} {
  func.func @_zinb_kernel(%arg0: i32, %arg1: i32, %arg2: memref<8x128xf32, #tpu.memory_space<vmem>>, %arg3: memref<8x128xf32, #tpu.memory_space<vmem>>, %arg4: memref<8x128xf32, #tpu.memory_space<vmem>>, %arg5: memref<8x128xf32, #tpu.memory_space<vmem>>, %arg6: memref<8x1xf32, #tpu.memory_space<vmem>>, %arg7: memref<8x128xf32, #tpu.memory_space<vmem>>) attributes {dimension_semantics = [#tpu.dimension_semantics<parallel>, #tpu.dimension_semantics<parallel>], iteration_bounds = array<i64: 2, 2>, scalar_prefetch = 0 : i64, scratch_operands = 0 : i64, tpu.core_type = #tpu.core_type<tc>, window_params = [{transform_indices = @transform_0, window_bounds = array<i64: 8, 128>}, {transform_indices = @transform_1, window_bounds = array<i64: 8, 128>}, {transform_indices = @transform_2, window_bounds = array<i64: 8, 128>}, {transform_indices = @transform_3, window_bounds = array<i64: 8, 128>}, {transform_indices = @transform_4, window_bounds = array<i64: 8, 1>}, {transform_indices = @transform_5, window_bounds = array<i64: 8, 128>}]} {
    %c0 = arith.constant 0 : index
    %c0_0 = arith.constant 0 : index
    %0 = vector.load %arg2[%c0, %c0_0] : memref<8x128xf32, #tpu.memory_space<vmem>>, vector<8x128xf32>
    %c0_1 = arith.constant 0 : index
    %c0_2 = arith.constant 0 : index
    %1 = vector.load %arg4[%c0_1, %c0_2] : memref<8x128xf32, #tpu.memory_space<vmem>>, vector<8x128xf32>
    %c0_3 = arith.constant 0 : index
    %c0_4 = arith.constant 0 : index
    %2 = vector.load %arg5[%c0_3, %c0_4] : memref<8x128xf32, #tpu.memory_space<vmem>>, vector<8x128xf32>
    %c0_5 = arith.constant 0 : index
    %c0_6 = arith.constant 0 : index
    %3 = vector.load %arg6[%c0_5, %c0_6] : memref<8x1xf32, #tpu.memory_space<vmem>>, vector<8x1xf32>
    %c0_7 = arith.constant 0 : index
    %c0_8 = arith.constant 0 : index
    %4 = vector.load %arg3[%c0_7, %c0_8] : memref<8x128xf32, #tpu.memory_space<vmem>>, vector<8x128xf32>
    %5 = vector.broadcast %3 : vector<8x1xf32> to vector<8x128xf32>
    %6 = arith.mulf %4, %5 : vector<8x128xf32>
    %cst = arith.constant 9.99999996E-13 : f32
    %7 = vector.broadcast %cst : f32 to vector<8x128xf32>
    %8 = arith.addf %1, %7 : vector<8x128xf32>
    %cst_9 = arith.constant 1.000000e+00 : f32
    %9 = vector.broadcast %cst_9 : f32 to vector<8x128xf32>
    %10 = arith.addf %0, %9 : vector<8x128xf32>
    %11 = arith.addf %0, %8 : vector<8x128xf32>
    %12 = math.log %8 : vector<8x128xf32>
    %13 = arith.addf %8, %6 : vector<8x128xf32>
    %14 = math.log %13 : vector<8x128xf32>
    %cst_10 = arith.constant 9.99999996E-13 : f32
    %15 = vector.broadcast %cst_10 : f32 to vector<8x128xf32>
    %16 = arith.addf %6, %15 : vector<8x128xf32>
    %17 = math.log %16 : vector<8x128xf32>
    %cst_11 = arith.constant 5.000000e-01 : f32
    %18 = vector.broadcast %cst_11 : f32 to vector<8x128xf32>
    %19 = arith.subf %8, %18 : vector<8x128xf32>
    %cst_12 = arith.constant 4.500000e+00 : f32
    %20 = vector.broadcast %cst_12 : f32 to vector<8x128xf32>
    %21 = arith.addf %8, %20 : vector<8x128xf32>
    %22 = math.log %21 : vector<8x128xf32>
    %23 = arith.mulf %19, %22 : vector<8x128xf32>
    %cst_13 = arith.constant 5.000000e-01 : f32
    %24 = vector.broadcast %cst_13 : f32 to vector<8x128xf32>
    %25 = arith.addf %0, %24 : vector<8x128xf32>
    %cst_14 = arith.constant 5.500000e+00 : f32
    %26 = vector.broadcast %cst_14 : f32 to vector<8x128xf32>
    %27 = arith.addf %0, %26 : vector<8x128xf32>
    %28 = math.log %27 : vector<8x128xf32>
    %29 = arith.mulf %25, %28 : vector<8x128xf32>
    %30 = arith.addf %23, %29 : vector<8x128xf32>
    %cst_15 = arith.constant 5.000000e-01 : f32
    %31 = vector.broadcast %cst_15 : f32 to vector<8x128xf32>
    %32 = arith.subf %11, %31 : vector<8x128xf32>
    %cst_16 = arith.constant 4.500000e+00 : f32
    %33 = vector.broadcast %cst_16 : f32 to vector<8x128xf32>
    %34 = arith.addf %11, %33 : vector<8x128xf32>
    %35 = math.log %34 : vector<8x128xf32>
    %36 = arith.mulf %32, %35 : vector<8x128xf32>
    %37 = arith.subf %30, %36 : vector<8x128xf32>
    %cst_17 = arith.constant -4.58106136 : f32
    %38 = vector.broadcast %cst_17 : f32 to vector<8x128xf32>
    %39 = arith.addf %37, %38 : vector<8x128xf32>
    %cst_18 = arith.constant 8.192000e+03 : f32
    %40 = vector.broadcast %cst_18 : f32 to vector<8x128xf32>
    %41 = arith.minimumf %8, %40 : vector<8x128xf32>
    %cst_19 = arith.constant 8.192000e+03 : f32
    %42 = vector.broadcast %cst_19 : f32 to vector<8x128xf32>
    %43 = arith.minimumf %10, %42 : vector<8x128xf32>
    %cst_20 = arith.constant 8.192000e+03 : f32
    %44 = vector.broadcast %cst_20 : f32 to vector<8x128xf32>
    %45 = arith.minimumf %11, %44 : vector<8x128xf32>
    %cst_21 = arith.constant 7.27595761E-12 : f32
    %46 = vector.broadcast %cst_21 : f32 to vector<8x128xf32>
    %47 = arith.mulf %46, %41 : vector<8x128xf32>
    %cst_22 = arith.constant 1.99785674E-10 : f32
    %48 = vector.broadcast %cst_22 : f32 to vector<8x128xf32>
    %49 = arith.addf %47, %48 : vector<8x128xf32>
    %50 = arith.mulf %49, %41 : vector<8x128xf32>
    %cst_23 = arith.constant 2.28496022E-9 : f32
    %51 = vector.broadcast %cst_23 : f32 to vector<8x128xf32>
    %52 = arith.addf %50, %51 : vector<8x128xf32>
    %53 = arith.mulf %52, %41 : vector<8x128xf32>
    %cst_24 = arith.constant 1.39331382E-8 : f32
    %54 = vector.broadcast %cst_24 : f32 to vector<8x128xf32>
    %55 = arith.addf %53, %54 : vector<8x128xf32>
    %56 = arith.mulf %55, %41 : vector<8x128xf32>
    %cst_25 = arith.constant 4.77754476E-8 : f32
    %57 = vector.broadcast %cst_25 : f32 to vector<8x128xf32>
    %58 = arith.addf %56, %57 : vector<8x128xf32>
    %59 = arith.mulf %58, %41 : vector<8x128xf32>
    %cst_26 = arith.constant 8.73429186E-8 : f32
    %60 = vector.broadcast %cst_26 : f32 to vector<8x128xf32>
    %61 = arith.addf %59, %60 : vector<8x128xf32>
    %62 = arith.mulf %61, %41 : vector<8x128xf32>
    %cst_27 = arith.constant 6.65139765E-8 : f32
    %63 = vector.broadcast %cst_27 : f32 to vector<8x128xf32>
    %64 = arith.addf %62, %63 : vector<8x128xf32>
    %cst_28 = arith.constant 7.27595761E-12 : f32
    %65 = vector.broadcast %cst_28 : f32 to vector<8x128xf32>
    %66 = arith.mulf %65, %43 : vector<8x128xf32>
    %cst_29 = arith.constant 1.99785674E-10 : f32
    %67 = vector.broadcast %cst_29 : f32 to vector<8x128xf32>
    %68 = arith.addf %66, %67 : vector<8x128xf32>
    %69 = arith.mulf %68, %43 : vector<8x128xf32>
    %cst_30 = arith.constant 2.28496022E-9 : f32
    %70 = vector.broadcast %cst_30 : f32 to vector<8x128xf32>
    %71 = arith.addf %69, %70 : vector<8x128xf32>
    %72 = arith.mulf %71, %43 : vector<8x128xf32>
    %cst_31 = arith.constant 1.39331382E-8 : f32
    %73 = vector.broadcast %cst_31 : f32 to vector<8x128xf32>
    %74 = arith.addf %72, %73 : vector<8x128xf32>
    %75 = arith.mulf %74, %43 : vector<8x128xf32>
    %cst_32 = arith.constant 4.77754476E-8 : f32
    %76 = vector.broadcast %cst_32 : f32 to vector<8x128xf32>
    %77 = arith.addf %75, %76 : vector<8x128xf32>
    %78 = arith.mulf %77, %43 : vector<8x128xf32>
    %cst_33 = arith.constant 8.73429186E-8 : f32
    %79 = vector.broadcast %cst_33 : f32 to vector<8x128xf32>
    %80 = arith.addf %78, %79 : vector<8x128xf32>
    %81 = arith.mulf %80, %43 : vector<8x128xf32>
    %cst_34 = arith.constant 6.65139765E-8 : f32
    %82 = vector.broadcast %cst_34 : f32 to vector<8x128xf32>
    %83 = arith.addf %81, %82 : vector<8x128xf32>
    %84 = arith.mulf %64, %83 : vector<8x128xf32>
    %cst_35 = arith.constant 7.27595761E-12 : f32
    %85 = vector.broadcast %cst_35 : f32 to vector<8x128xf32>
    %86 = arith.mulf %85, %45 : vector<8x128xf32>
    %cst_36 = arith.constant 1.09139364E-10 : f32
    %87 = vector.broadcast %cst_36 : f32 to vector<8x128xf32>
    %88 = arith.addf %86, %87 : vector<8x128xf32>
    %89 = arith.mulf %88, %45 : vector<8x128xf32>
    %cst_37 = arith.constant 6.18456397E-10 : f32
    %90 = vector.broadcast %cst_37 : f32 to vector<8x128xf32>
    %91 = arith.addf %89, %90 : vector<8x128xf32>
    %92 = arith.mulf %91, %45 : vector<8x128xf32>
    %cst_38 = arith.constant 1.63709046E-9 : f32
    %93 = vector.broadcast %cst_38 : f32 to vector<8x128xf32>
    %94 = arith.addf %92, %93 : vector<8x128xf32>
    %95 = arith.mulf %94, %45 : vector<8x128xf32>
    %cst_39 = arith.constant 1.99361239E-9 : f32
    %96 = vector.broadcast %cst_39 : f32 to vector<8x128xf32>
    %97 = arith.addf %95, %96 : vector<8x128xf32>
    %98 = arith.mulf %97, %45 : vector<8x128xf32>
    %cst_40 = arith.constant 8.73114914E-10 : f32
    %99 = vector.broadcast %cst_40 : f32 to vector<8x128xf32>
    %100 = arith.addf %98, %99 : vector<8x128xf32>
    %101 = arith.mulf %100, %45 : vector<8x128xf32>
    %cst_41 = arith.constant 0.000000e+00 : f32
    %102 = vector.broadcast %cst_41 : f32 to vector<8x128xf32>
    %103 = arith.addf %101, %102 : vector<8x128xf32>
    %104 = arith.mulf %84, %103 : vector<8x128xf32>
    %cst_42 = arith.constant 7.27595761E-12 : f32
    %105 = vector.broadcast %cst_42 : f32 to vector<8x128xf32>
    %106 = arith.mulf %105, %41 : vector<8x128xf32>
    %cst_43 = arith.constant 1.09139364E-10 : f32
    %107 = vector.broadcast %cst_43 : f32 to vector<8x128xf32>
    %108 = arith.addf %106, %107 : vector<8x128xf32>
    %109 = arith.mulf %108, %41 : vector<8x128xf32>
    %cst_44 = arith.constant 6.18456397E-10 : f32
    %110 = vector.broadcast %cst_44 : f32 to vector<8x128xf32>
    %111 = arith.addf %109, %110 : vector<8x128xf32>
    %112 = arith.mulf %111, %41 : vector<8x128xf32>
    %cst_45 = arith.constant 1.63709046E-9 : f32
    %113 = vector.broadcast %cst_45 : f32 to vector<8x128xf32>
    %114 = arith.addf %112, %113 : vector<8x128xf32>
    %115 = arith.mulf %114, %41 : vector<8x128xf32>
    %cst_46 = arith.constant 1.99361239E-9 : f32
    %116 = vector.broadcast %cst_46 : f32 to vector<8x128xf32>
    %117 = arith.addf %115, %116 : vector<8x128xf32>
    %118 = arith.mulf %117, %41 : vector<8x128xf32>
    %cst_47 = arith.constant 8.73114914E-10 : f32
    %119 = vector.broadcast %cst_47 : f32 to vector<8x128xf32>
    %120 = arith.addf %118, %119 : vector<8x128xf32>
    %121 = arith.mulf %120, %41 : vector<8x128xf32>
    %cst_48 = arith.constant 0.000000e+00 : f32
    %122 = vector.broadcast %cst_48 : f32 to vector<8x128xf32>
    %123 = arith.addf %121, %122 : vector<8x128xf32>
    %cst_49 = arith.constant 7.27595761E-12 : f32
    %124 = vector.broadcast %cst_49 : f32 to vector<8x128xf32>
    %125 = arith.mulf %124, %43 : vector<8x128xf32>
    %cst_50 = arith.constant 1.09139364E-10 : f32
    %126 = vector.broadcast %cst_50 : f32 to vector<8x128xf32>
    %127 = arith.addf %125, %126 : vector<8x128xf32>
    %128 = arith.mulf %127, %43 : vector<8x128xf32>
    %cst_51 = arith.constant 6.18456397E-10 : f32
    %129 = vector.broadcast %cst_51 : f32 to vector<8x128xf32>
    %130 = arith.addf %128, %129 : vector<8x128xf32>
    %131 = arith.mulf %130, %43 : vector<8x128xf32>
    %cst_52 = arith.constant 1.63709046E-9 : f32
    %132 = vector.broadcast %cst_52 : f32 to vector<8x128xf32>
    %133 = arith.addf %131, %132 : vector<8x128xf32>
    %134 = arith.mulf %133, %43 : vector<8x128xf32>
    %cst_53 = arith.constant 1.99361239E-9 : f32
    %135 = vector.broadcast %cst_53 : f32 to vector<8x128xf32>
    %136 = arith.addf %134, %135 : vector<8x128xf32>
    %137 = arith.mulf %136, %43 : vector<8x128xf32>
    %cst_54 = arith.constant 8.73114914E-10 : f32
    %138 = vector.broadcast %cst_54 : f32 to vector<8x128xf32>
    %139 = arith.addf %137, %138 : vector<8x128xf32>
    %140 = arith.mulf %139, %43 : vector<8x128xf32>
    %cst_55 = arith.constant 0.000000e+00 : f32
    %141 = vector.broadcast %cst_55 : f32 to vector<8x128xf32>
    %142 = arith.addf %140, %141 : vector<8x128xf32>
    %143 = arith.mulf %123, %142 : vector<8x128xf32>
    %cst_56 = arith.constant 7.27595761E-12 : f32
    %144 = vector.broadcast %cst_56 : f32 to vector<8x128xf32>
    %145 = arith.mulf %144, %45 : vector<8x128xf32>
    %cst_57 = arith.constant 1.99785674E-10 : f32
    %146 = vector.broadcast %cst_57 : f32 to vector<8x128xf32>
    %147 = arith.addf %145, %146 : vector<8x128xf32>
    %148 = arith.mulf %147, %45 : vector<8x128xf32>
    %cst_58 = arith.constant 2.28496022E-9 : f32
    %149 = vector.broadcast %cst_58 : f32 to vector<8x128xf32>
    %150 = arith.addf %148, %149 : vector<8x128xf32>
    %151 = arith.mulf %150, %45 : vector<8x128xf32>
    %cst_59 = arith.constant 1.39331382E-8 : f32
    %152 = vector.broadcast %cst_59 : f32 to vector<8x128xf32>
    %153 = arith.addf %151, %152 : vector<8x128xf32>
    %154 = arith.mulf %153, %45 : vector<8x128xf32>
    %cst_60 = arith.constant 4.77754476E-8 : f32
    %155 = vector.broadcast %cst_60 : f32 to vector<8x128xf32>
    %156 = arith.addf %154, %155 : vector<8x128xf32>
    %157 = arith.mulf %156, %45 : vector<8x128xf32>
    %cst_61 = arith.constant 8.73429186E-8 : f32
    %158 = vector.broadcast %cst_61 : f32 to vector<8x128xf32>
    %159 = arith.addf %157, %158 : vector<8x128xf32>
    %160 = arith.mulf %159, %45 : vector<8x128xf32>
    %cst_62 = arith.constant 6.65139765E-8 : f32
    %161 = vector.broadcast %cst_62 : f32 to vector<8x128xf32>
    %162 = arith.addf %160, %161 : vector<8x128xf32>
    %163 = arith.mulf %143, %162 : vector<8x128xf32>
    %164 = tpu.reciprocal %163 {approx = true} : vector<8x128xf32> -> vector<8x128xf32>
    %165 = arith.mulf %104, %164 : vector<8x128xf32>
    %166 = math.log %165 : vector<8x128xf32>
    %167 = arith.addf %39, %166 : vector<8x128xf32>
    %168 = arith.addf %1, %0 : vector<8x128xf32>
    %169 = arith.subf %14, %12 : vector<8x128xf32>
    %170 = arith.mulf %168, %169 : vector<8x128xf32>
    %171 = arith.subf %12, %17 : vector<8x128xf32>
    %172 = arith.mulf %0, %171 : vector<8x128xf32>
    %173 = arith.addf %170, %172 : vector<8x128xf32>
    %174 = arith.addf %167, %173 : vector<8x128xf32>
    %cst_63 = arith.constant 1.000000e+00 : f32
    %175 = vector.broadcast %cst_63 : f32 to vector<8x128xf32>
    %176 = arith.subf %175, %2 : vector<8x128xf32>
    %cst_64 = arith.constant 9.99999996E-13 : f32
    %177 = vector.broadcast %cst_64 : f32 to vector<8x128xf32>
    %178 = arith.addf %176, %177 : vector<8x128xf32>
    %179 = math.log %178 : vector<8x128xf32>
    %180 = arith.subf %174, %179 : vector<8x128xf32>
    %181 = arith.subf %12, %14 : vector<8x128xf32>
    %182 = arith.mulf %1, %181 : vector<8x128xf32>
    %183 = math.exp %182 : vector<8x128xf32>
    %cst_65 = arith.constant 1.000000e+00 : f32
    %184 = vector.broadcast %cst_65 : f32 to vector<8x128xf32>
    %185 = arith.subf %184, %2 : vector<8x128xf32>
    %186 = arith.mulf %185, %183 : vector<8x128xf32>
    %187 = arith.addf %2, %186 : vector<8x128xf32>
    %cst_66 = arith.constant 9.99999996E-13 : f32
    %188 = vector.broadcast %cst_66 : f32 to vector<8x128xf32>
    %189 = arith.addf %187, %188 : vector<8x128xf32>
    %190 = math.log %189 : vector<8x128xf32>
    %cst_67 = arith.constant 0.000000e+00 : f32
    %191 = vector.broadcast %cst_67 : f32 to vector<8x128xf32>
    %192 = arith.subf %191, %190 : vector<8x128xf32>
    %cst_68 = arith.constant 9.99999993E-9 : f32
    %193 = vector.broadcast %cst_68 : f32 to vector<8x128xf32>
    %194 = arith.cmpf ole, %0, %193 : vector<8x128xf32>
    %195 = arith.select %194, %192, %180 : vector<8x128xi1>, vector<8x128xf32>
    %196 = vector.shape_cast %195 : vector<8x128xf32> to vector<1x8x128xf32>
    %cst_69 = arith.constant dense<0.000000e+00> : vector<8x128xf32>
    %197 = vector.multi_reduction <add>, %196, %cst_69 [0] : vector<1x8x128xf32> to vector<8x128xf32>
    %c0_70 = arith.constant 0 : index
    %c0_71 = arith.constant 0 : index
    %198 = vector.load %arg7[%c0_70, %c0_71] : memref<8x128xf32, #tpu.memory_space<vmem>>, vector<8x128xf32>
    tpu.vector_store %arg7[%c0_70, %c0_71], %197 {strides = array<i32>} : memref<8x128xf32, #tpu.memory_space<vmem>>, vector<8x128xf32>,
    return
  }
  func.func @transform_0(%arg0: i32, %arg1: i32) -> (i32, i32) {
    %c0_i32 = arith.constant 0 : i32
    return %arg0, %arg1 : i32, i32
  }
  func.func @transform_1(%arg0: i32, %arg1: i32) -> (i32, i32) {
    %c0_i32 = arith.constant 0 : i32
    return %arg0, %arg1 : i32, i32
  }
  func.func @transform_2(%arg0: i32, %arg1: i32) -> (i32, i32) {
    %c0_i32 = arith.constant 0 : i32
    return %arg0, %arg1 : i32, i32
  }
  func.func @transform_3(%arg0: i32, %arg1: i32) -> (i32, i32) {
    %c0_i32 = arith.constant 0 : i32
    return %arg0, %arg1 : i32, i32
  }
  func.func @transform_4(%arg0: i32, %arg1: i32) -> (i32, i32) {
    %c0_i32 = arith.constant 0 : i32
    %c0_i32_0 = arith.constant 0 : i32
    return %arg0, %c0_i32 : i32, i32
  }
  func.func @transform_5(%arg0: i32, %arg1: i32) -> (i32, i32) {
    %c0_i32 = arith.constant 0 : i32
    return %arg0, %arg1 : i32, i32
  }
}

</mosaic_0001>

<bundles_post_ra>
// kernel: tpu_custom_call.1
= control target key start
LH: loop header
LB: loop body
LE: loop exit
PB: predicated region body
PF: predicated region fallthrough
CT: control target
= control target key end

     0   :  { %s1426_s0 = inlined_call_operand.hbm [shape: f32[16,256], index: 0, kind: input, shape index: {}]   ;;  %s1427_s1 = inlined_call_operand.hbm [shape: f32[16,256], index: 1, kind: input, shape index: {}]   ;;  %s1428_s2 = inlined_call_operand.hbm [shape: f32[16,256], index: 2, kind: input, shape index: {}]   ;;  %s1429_s3 = inlined_call_operand.hbm [shape: f32[16,256], index: 3, kind: input, shape index: {}]   ;;  %s1430_s4 = inlined_call_operand.vmem [shape: f32[16,1], index: 4, kind: input, shape index: {}]   ;;  %s1431_s5 = inlined_call_operand.hbm [shape: f32[16,256], index: 5, kind: output, shape index: {}]  }
   0x1   :  { %1441 = sst [smem:[#allocation24_spill]] %s1426_s0 }
   0x2   :  { %1442 = sst [smem:[#allocation25_spill]] %s1427_s1 }
   0x3   :  { %10 = vsyncpa [#allocation3], 0 }
   0x4   :  { %12 = vsyncpa [#allocation3 + $0x1], 0 }
   0x5   :  { %13 = vsyncpa [#allocation6], 0 }
   0x6   :  { %15 = vsyncpa [#allocation6 + $0x1], 0 }
   0x7   :  { %16 = vsyncpa [#allocation9], 0 }
   0x8   :  { %18 = vsyncpa [#allocation9 + $0x1], 0 }
   0x9   :  { %19 = vsyncpa [#allocation4], 0 }
   0xa   :  { %21 = vsyncpa [#allocation4 + $0x1], 0  ;;  %s1143_s18 = smov 0   ;;  %s1145_s19 = smov 0  }
   0xb   :  { %s1147_s20 = smov 0   ;;  %s1149_s21 = smov 0  }
   0xc   :  { %s1151_s22 = smov 0   ;;  %s1153_s23 = smov 0  }
   0xd   :  { %s1155_s24 = smov 0   ;;  %s1157_s25 = smov 0  }
   0xe LB: > { %1443 = sst [smem:[#allocation15_spill]] %s1082_s18  ;;  %s1184_s26 = sadd.s32 4294967295, %s1110_s25   ;;  %s1110_s25 = sphi %s1157_s25, %s27_s25   ;;  %s1106_s24 = sphi %s1155_s24, %s1468_s24   ;;  %s1102_s23 = sphi %s1153_s23, %s1467_s23   ;;  %s1098_s22 = sphi %s1151_s22, %s1466_s22   ;;  %s1094_s21 = sphi %s1149_s21, %s1465_s21   ;;  %s1090_s20 = sphi %s1147_s20, %s1464_s20   ;;  %s1086_s19 = sphi %s1145_s19, %s1470_s19   ;;  %s1082_s18 = sphi %s1143_s18, %s1469_s18  }
   0xf   : > { %1444 = sst [smem:[#allocation16_spill]] %s1090_s20  ;;  %s738_s27 = sadd.s32 4294967294, %s1110_s25  }
  0x10   : > { %1445 = sst [smem:[#allocation17_spill]] %s1102_s23  ;;  %s36_s28 = sadd.s32 1, %s1102_s23 }
  0x11   : > { %1446 = sst [smem:[#allocation18_spill]] %s1106_s24  ;;  %s39_s29 = sadd.s32 1, %s1106_s24 }
  0x12   : > { %1447 = sst [smem:[#allocation19_spill]] %s1110_s25  ;;  %p37_p0 = scmp.ge.s32.totalorder %s36_s28, 2 }
  0x13   : > { %s48_s30 = sadd.s32 1, %s1090_s20  ;;  %p55_p1 = scmp.ne.s32.totalorder %s1090_s20, %s1086_s19 }
  0x14   : > { %p56_p2 = scmp.eq.s32.totalorder %s1110_s25, 0  ;;  %s1472_s28 = smov (%p37_p0, %s36_s28), 0 }
  0x15   : > { %1448 = sst [smem:[#allocation20_spill]] %s1472_s28  ;;  %s1474_s29 = smov (!%p37_p0, %s39_s29), %s1106_s24 }
  0x16   : > { %s44_s6 = ssub.s32 %s1102_s23, %s1472_s28  ;;  %p1198_p3 = por %p56_p2, %p55_p1 }
  0x17   : > { %p41_p4 = scmp.ge.s32.totalorder %s1474_s29, 2  ;;  %p61_p5 = scmp.ne.s32.totalorder %s1086_s19, %s1082_s18 }
  0x18   : > { %p62_p6 = scmp.eq.s32.totalorder %s1184_s26, 0  ;;  %p197_p7 = scmp.eq.s32.totalorder %s1184_s26, 3 }
  0x19   : > { %s1476_s29 = smov (%p41_p4, %s1474_s29), 0  ;;  %p203_p10 = scmp.eq.s32.totalorder %s738_s27, 3 }
  0x1a   : > { %1450 = sst [smem:[#allocation21_spill]] %s1476_s29  ;;  %p1208_p8 = por %p62_p6, %p61_p5 }
  0x1b   : > { %p1212_p9 = por %p197_p7, %p55_p1  ;;  %s43_s10 = ssub.s32 %s1106_s24, %s1476_s29 }
  0x1c   : > { %s45_s11 = sor.u32 %s44_s6, %s43_s10  ;;  %p1218_p12 = por %p203_p10, %p61_p5 }
  0x1d   : > { %p46_p11 = scmp.eq.s32.totalorder %s45_s11, 0  ;;  %p794_p13 = scmp.lt.s32.totalorder %s1110_s25, 4 }
  0x1e   : > { %s1453_s12 = scalar_select %p1218_p12, 1, 0 }
  0x1f   : > { %s1224_s13 = sand.u32 1, %s1090_s20   ;;  %s742_s16 = sshll.u32 %s1106_s24, 1 }
  0x20   : > { %1454 = sst [smem:[#allocation22_spill]] %s1453_s12  ;;  %s1230_s15 = sshll.u32 %s1224_s13, 3 }
  0x21   : > { %s1227_s14 = scalar_select %p46_p11, %s1090_s20, %s48_s30  }
  0x22   : > { %s231_s17 = sadd.s32 %s1102_s23, %s742_s16  ;;  %p1236_p0 = pnand %p794_p13, %p1198_p3 }
  0x23   : > { %1455 = sst [smem:[#allocation23_spill]] %s1227_s14  ;;  %s1240_s6 = sshll.u32 %s231_s17, 3 }
  0x24   : > { %s244_s10 = sand.u32 1, %s1110_s25   ;;  %s1457_s1 = sld [smem:[#allocation25_spill]] }
  0x25   : > { %s248_s24 = scalar_lea.vmem [#allocation5], %s1230_s15  ;;  %s245_s16 = scalar_lea.sflag [#allocation6], %s244_s10 }
  0x26   : > { %s258_s7 = sshll.u32 %s248_s24, 4  ;;  %p753_p1 = scmp.ge.s32.totalorder %s1110_s25, 1  ;;  %s259_s7 = int_to_ptr.vmem [resolvable:$true] %s258_s7 }
  0x27   : > { %p312_p2 = scmp.lt.s32.totalorder %s1110_s25, 5  ;;  %s1459_s0 = sld [smem:[#allocation24_spill]] }
  0x28   : > { %s275_s14 = scalar_lea.hbm %s1428_s2, %s1240_s6  ;;  %s269_s12 = scalar_lea.vmem [#allocation7], %s1230_s15 }
  0x29   : > { %p1252_p3 = pnand %p753_p1, %p312_p2  ;;  %s277_s20 = sshll.u32 %s275_s14, 4  ;;  %s278_s20 = int_to_ptr.hbm [resolvable:$true] %s277_s20 }
  0x2a   : > { %s254_s29 = scalar_lea.hbm %s1457_s1, %s1240_s6  ;;  %s227_s1 = scalar_lea.vmem [#allocation2], %s1230_s15 }
  0x2b   : > { %s256_s28 = sshll.u32 %s254_s29, 4  ;;  %s237_s23 = sshll.u32 %s227_s1, 4  ;;  %s257_s28 = int_to_ptr.hbm [resolvable:$true] %s256_s28  ;;  %s238_s23 = int_to_ptr.vmem [resolvable:$true] %s237_s23 }
  0x2c   : > { %783 = dma.hbm_to_vmem [thread:$0]  (!%p1236_p0), %s257_s28, 128, %s259_s7, %s245_s16  }
  0x2d   : > { %s233_s11 = scalar_lea.hbm %s1459_s0, %s1240_s6  ;;  %s224_s28 = scalar_lea.sflag [#allocation3], %s1224_s13 }
  0x2e   : > { %s235_s24 = sshll.u32 %s233_s11, 4  ;;  %s279_s30 = sshll.u32 %s269_s12, 4  ;;  %s236_s24 = int_to_ptr.hbm [resolvable:$true] %s235_s24  ;;  %s280_s30 = int_to_ptr.vmem [resolvable:$true] %s279_s30 }
  0x2f   : > { %780 = dma.hbm_to_vmem [thread:$0]  (!%p1236_p0), %s236_s24, 128, %s238_s23, %s224_s28  }
  0x30   : > { %786 = dma.hbm_to_vmem [thread:$0]  (!%p1236_p0), %s278_s20, 128, %s280_s30, %s245_s16  }
  0x31   : > { %s296_s11 = scalar_lea.hbm %s1429_s3, %s1240_s6  ;;  %s290_s0 = scalar_lea.vmem [#allocation8], %s1230_s15 }
  0x32   : > { %s300_s18 = sshll.u32 %s290_s0, 4  ;;  %s298_s25 = sshll.u32 %s296_s11, 4  ;;  %s301_s18 = int_to_ptr.vmem [resolvable:$true] %s300_s18  ;;  %s299_s25 = int_to_ptr.hbm [resolvable:$true] %s298_s25 }
  0x33   : > { %s287_s23 = scalar_lea.sflag [#allocation9], %s1224_s13  ;;  %316 = sbr.rel (%p1252_p3) target bundleno = 232 (0xe8), region = 40 }
  0x34   : > { %789 = dma.hbm_to_vmem [thread:$0]  (!%p1236_p0), %s299_s25, 128, %s301_s18, %s287_s23  }
  0x35   : > { %s1282_s12 = sand.u32 (!%p1252_p3), 1, %s1086_s19  }
  0x36   : > { %s1285_s20 = sshll.u32 (!%p1252_p3), %s1282_s12, 3  ;;  %s319_s14 = scalar_lea.sflag (!%p1252_p3), [#allocation3], %s1282_s12 }
  0x37   : > { %s322_s0 = scalar_lea.vmem (!%p1252_p3), [#allocation2], %s1285_s20 }
  0x38   : > { %1065 = dma.done.wait (%p1208_p8), %s319_s14, 128  }
  0x39   : > { %1067 = vsyncadd (%p1208_p8), %s319_s14, 4294967168  ;;  %s328_s18 = sand.u32 1, %s1184_s26   ;;  %s332_s13 = scalar_lea.vmem [#allocation5], %s1285_s20 }
  0x3a   : > { %s329_s25 = scalar_lea.sflag [#allocation6], %s328_s18 }
  0x3b   : > { %1069 = dma.done.wait (%p1208_p8), %s329_s25, 256  }
  0x3c   : > { %1071 = vsyncadd (%p1208_p8), %s329_s25, 4294967040  ;;  %s342_s15 = scalar_lea.vmem [#allocation7], %s1285_s20  ;;  %s349_s27 = scalar_lea.sflag [#allocation9], %s1282_s12 }
  0x3d   : > { %s352_s6 = scalar_lea.vmem [#allocation8], %s1285_s20 }
  0x3e   : > { %1073 = dma.done.wait (%p1208_p8), %s349_s27, 128  }
  0x3f   : > { %1075 = vsyncadd (%p1208_p8), %s349_s27, 4294967168  ;;  %p399_p4 = scmp.lt.s32.totalorder %s1098_s22, 1  ;;  %v1112_v0 = vmov 0   ;;  %v1311_v2 = vld [vmem:[%s342_s15] sm:$0xff]  ;;  %s763_s8 = sshll.u32 %s1098_s22, 1 }
  0x40   : > { %861 = vset.pattern.permute.xlu0 %v1112_v0  ;;  %v1314_v3 = vadd.f32 1e-12, %v1311_v2  ;;  %v1316_v4 = vld [vmem:[%s322_s0] sm:$0xff]  ;;  %s561_s10 = sadd.s32 %s1094_s21, %s763_s8  ;;  %s398_s1 = scalar_lea.vmem [#allocation10], %s1285_s20 }
  0x41   : > { %s400_s26 = scalar_select %p399_p4, %s1098_s22, 1  ;;  %v415_v5 = vadd.f32 1.0, %v1316_v4  ;;  %vm546_vm0 = vcmp.le.f32.partialorder %v1316_v4, 1e-08 }
  0x42   : > { %v1321_v6 = vadd.f32 %v1314_v3, %v1316_v4  ;;  %v1324_v7 = vmin.f32 %v1314_v3, 8192.0  ;;  %862 = vlog2.f32 %v1314_v3  ;;  %s764_s7 = sshll.u32 %s561_s10, 3  ;;  %s565_s11 = sshll.u32 %s398_s1, 4  ;;  %s566_s11 = int_to_ptr.vmem [resolvable:$true] %s565_s11 }
  0x43   : > { %s759_s16 = sshll.u32 %s400_s26, 3  ;;  %v1326_v8 = vmin.f32 %v415_v5, 8192.0  ;;  %s563_s22 = scalar_lea.hbm %s1431_s5, %s764_s7 }
  0x44   : > { %s402_s28 = scalar_lea.vmem %s1430_s4, %s759_s16  ;;  %v1329_v9 = vmin.f32 %v1321_v6, 8192.0  ;;  %v446_v10 = vmul.f32 7.2759576e-12, %v1324_v7  ;;  %s567_s23 = sshll.u32 %s563_s22, 4  ;;  %s568_s23 = int_to_ptr.hbm [resolvable:$true] %s567_s23 }
  0x45   : > { %v406_v1 = vld [vmem:[%s402_s28] sm:$0xff]  ;;  %v458_v11 = vmul.f32 7.2759576e-12, %v1326_v8  ;;  %s551_s21 = scalar_lea.sflag [#allocation4], %s1282_s12  ;;  %s1018_s14 = sshra.s32 %s568_s23, 4  ;;  %s1019_s14 = int_to_ptr.hbm [resolvable:$true] %s1018_s14 }
  0x46   : > { %410 = vperm.xlu0 %861, %v406_v1   ;;  %v471_v12 = vmul.f32 7.2759576e-12, %v1329_v9  ;;  %v484_v13 = vadd.f32 1.09139364e-10, %v446_v10  ;;  %v447_v16 = vadd.f32 1.9978567e-10, %v446_v10  ;;  %s1020_s0 = scalar_lea.hbm %s1019_s14, 8  ;;  %s1024_s25 = scalar_lea.hbm %s1431_s5, 32 }
  0x47   : > { %v495_v14 = vadd.f32 1.09139364e-10, %v458_v11  ;;  %v459_v20 = vadd.f32 1.9978567e-10, %v458_v11  ;;  %v407_v11 = vld [vmem:[%s332_s13] sm:$0xff]  ;;  %p1021_p5 = scmp.ne.s32.totalorder %s1019_s14, %s1020_s0  ;;  %p1025_p8 = scmp.lt.s32.totalorder %s1019_s14, %s1431_s5 }
  0x48   : > { %v507_v15 = vadd.f32 1.9978567e-10, %v471_v12  ;;  %v485_v17 = vmul.f32 %v484_v13, %v1324_v7  ;;  %v448_v21 = vmul.f32 %v447_v16, %v1324_v7  ;;  %v472_v31 = vadd.f32 1.09139364e-10, %v471_v12  ;;  %p1026_p10 = scmp.lt.s32.totalorder %s1024_s25, %s1020_s0 }
  0x49   : > { %v496_v18 = vmul.f32 %v495_v14, %v1326_v8  ;;  %v460_v25 = vmul.f32 %v459_v20, %v1326_v8  ;;  %v426_v12 = vadd.f32 4.5, %v1314_v3  ;;  %v431_v14 = vadd.f32 5.5, %v1316_v4  ;;  %p1022_p6 = pnand %p1021_p5, %p1212_p9 }
  0x4a   : > { %v508_v19 = vmul.f32 %v507_v15, %v1329_v9  ;;  %v486_v22 = vadd.f32 6.184564e-10, %v485_v17  ;;  %v449_v26 = vadd.f32 2.2849602e-09, %v448_v21  ;;  %v473_v37 = vmul.f32 %v472_v31, %v1329_v9  ;;  %p1027_p11 = por %p1026_p10, %p1025_p8 }
  0x4b   : > { %v497_v23 = vadd.f32 6.184564e-10, %v496_v18  ;;  %v461_v30 = vadd.f32 2.2849602e-09, %v460_v25  ;;  %864 = vlog2.f32 %v426_v12  ;;  %p1023_p7 = pneg %p1022_p6 }
  0x4c   : > { %v509_v24 = vadd.f32 2.2849602e-09, %v508_v19  ;;  %v487_v27 = vmul.f32 %v486_v22, %v1324_v7  ;;  %v450_v32 = vmul.f32 %v449_v26, %v1324_v7  ;;  %v474_v43 = vadd.f32 6.184564e-10, %v473_v37  ;;  %v863_v26 = vpop.eup %862 }
  0x4d   : > { %v498_v28 = vmul.f32 %v497_v23, %v1326_v8  ;;  %v462_v36 = vmul.f32 %v461_v30, %v1326_v8  ;;  %866 = vlog2.f32 %v431_v14  ;;  %v437_v22 = vadd.f32 4.5, %v1321_v6  ;;  %p1028_p13 = pnand %p1027_p11, %p1023_p7 }
  0x4e   : > { %v510_v29 = vmul.f32 %v509_v24, %v1329_v9  ;;  %v488_v33 = vadd.f32 1.6370905e-09, %v487_v27  ;;  %v451_v38 = vadd.f32 1.3933138e-08, %v450_v32  ;;  %v475_v49 = vmul.f32 %v474_v43, %v1329_v9 }
  0x4f   : > { %v499_v34 = vadd.f32 1.6370905e-09, %v498_v28  ;;  %v463_v42 = vadd.f32 1.3933138e-08, %v462_v36  ;;  %v418_v31 = vmul.f32 0.6931472, %v863_v26 }
  0x50   : > { %v511_v35 = vadd.f32 1.3933138e-08, %v510_v29  ;;  %v489_v39 = vmul.f32 %v488_v33, %v1324_v7  ;;  %v452_v44 = vmul.f32 %v451_v38, %v1324_v7  ;;  %v476_v55 = vadd.f32 1.6370905e-09, %v475_v49 }
  0x51   : > { %v500_v40 = vmul.f32 %v499_v34, %v1326_v8  ;;  %v464_v48 = vmul.f32 %v463_v42, %v1326_v8  ;;  %v865_v27 = vpop.eup %864  ;;  %v760_v34 = vadd.f32 -0.5, %v1314_v3  ;;  %v430_v38 = vadd.f32 0.5, %v1316_v4 }
  0x52   : > { %v512_v41 = vmul.f32 %v511_v35, %v1329_v9  ;;  %v490_v45 = vadd.f32 1.9936124e-09, %v489_v39  ;;  %v453_v50 = vadd.f32 4.7775448e-08, %v452_v44  ;;  %v477_v61 = vmul.f32 %v476_v55, %v1329_v9  ;;  %v405_v44 = vld [vmem:[%s352_s6] sm:$0xff] }
  0x53   : > { %v501_v46 = vadd.f32 1.9936124e-09, %v500_v40  ;;  %v465_v54 = vadd.f32 4.7775448e-08, %v464_v48  ;;  %v867_v30 = vpop.eup %866  ;;  %v428_v35 = vmul.f32 0.6931472, %v865_v27  ;;  %v531_v49 = vsub.f32 1.0, %v405_v44 }
  0x54   : > { %v513_v47 = vadd.f32 4.7775448e-08, %v512_v41  ;;  %v491_v51 = vmul.f32 %v490_v45, %v1324_v7  ;;  %v454_v56 = vmul.f32 %v453_v50, %v1324_v7  ;;  %v478_v10 = vadd.f32 1.9936124e-09, %v477_v61 }
  0x55   : > { %v502_v52 = vmul.f32 %v501_v46, %v1326_v8  ;;  %v466_v60 = vmul.f32 %v465_v54, %v1326_v8  ;;  %v433_v39 = vmul.f32 0.6931472, %v867_v30  ;;  %v429_v43 = vmul.f32 %v760_v34, %v428_v35 }
  0x56   : > { %v514_v53 = vmul.f32 %v513_v47, %v1329_v9  ;;  %v492_v57 = vadd.f32 8.731149e-10, %v491_v51  ;;  %v455_v62 = vadd.f32 8.734292e-08, %v454_v56  ;;  %v479_v20 = vmul.f32 %v478_v10, %v1329_v9 }
  0x57   : > { %v503_v58 = vadd.f32 8.731149e-10, %v502_v52  ;;  %v467_v5 = vadd.f32 8.734292e-08, %v466_v60  ;;  %v434_v45 = vmul.f32 %v433_v39, %v430_v38  ;;  %v761_v46 = vadd.f32 -0.5, %v1321_v6 }
  0x58   : > { %v515_v59 = vadd.f32 8.734292e-08, %v514_v53  ;;  %v493_v63 = vmul.f32 %v492_v57, %v1324_v7  ;;  %v456_v15 = vmul.f32 %v455_v62, %v1324_v7  ;;  %v480_v7 = vadd.f32 8.731149e-10, %v479_v20 }
  0x59   : > { %v504_v0 = vmul.f32 %v503_v58, %v1326_v8  ;;  %v468_v19 = vmul.f32 %v467_v5, %v1326_v8  ;;  %v435_v51 = vadd.f32 %v434_v45, %v429_v43  ;;  %v532_v53 = vadd.f32 1e-12, %v531_v49 }
  0x5a   : > { %v516_v1 = vmul.f32 %v515_v59, %v1329_v9  ;;  %v457_v24 = vadd.f32 6.651398e-08, %v456_v15  ;;  %v481_v8 = vmul.f32 %v480_v7, %v1329_v9  ;;  %v524_v56 = vadd.f32 %v1311_v2, %v1316_v4 }
  0x5b   : > { %v506_v16 = vmul.f32 %v504_v0, %v493_v63  ;;  %v469_v25 = vadd.f32 6.651398e-08, %v468_v19 }
  0x5c   : > { %v517_v17 = vadd.f32 6.651398e-08, %v516_v1 }
  0x5d   : > { %v470_v29 = vmul.f32 %v469_v25, %v457_v24 }
  0x5e   : > { %v518_v23 = vmul.f32 %v517_v17, %v506_v16 }
  0x5f   : > { %v483_v36 = vmul.f32 %v481_v8, %v470_v29 }
  0xb8   : > { %v411_v13 = vpop.permute.xlu0 %410 }
  0xb9   : > { %v413_v18 = vmul.f32 %v411_v13, %v407_v11 }
  0xbb   : > { %v419_v21 = vadd.f32 %v1314_v3, %v413_v18  ;;  %v422_v28 = vadd.f32 1e-12, %v413_v18 }
  0xbd   : > { %868 = vlog2.f32 %v419_v21 }
  0xbe   : > { %870 = vrcp.f32 %v518_v23 }
  0xbf   : > { %872 = vlog2.f32 %v437_v22 }
  0xc0   : > { %874 = vlog2.f32 %v422_v28 }
  0xc3   : > { %v869_v32 = vpop.eup %868 }
  0xc4   : > { %v421_v33 = vmul.f32 0.6931472, %v869_v32  ;;  %v871_v37 = vpop.eup %870 }
  0xc5   : > { %v873_v41 = vpop.eup %872  ;;  %v520_v9 = vmul.f32 %v871_v37, %v483_v36 }
  0xc6   : > { %v536_v40 = vsub.f32 %v418_v31, %v421_v33  ;;  %v439_v47 = vmul.f32 0.6931472, %v873_v41  ;;  %v875_v3 = vpop.eup %874  ;;  %v525_v57 = vsub.f32 %v421_v33, %v418_v31 }
  0xc7   : > { %v424_v50 = vmul.f32 0.6931472, %v875_v3 }
  0xc8   : > { %v537_v42 = vmul.f32 %v536_v40, %v1311_v2  ;;  %v440_v52 = vmul.f32 %v761_v46, %v439_v47  ;;  %v526_v63 = vmul.f32 %v525_v57, %v524_v56 }
  0xc9   : > { %v527_v58 = vsub.f32 %v418_v31, %v424_v50 }
  0xca   : > { %v538_v48 = vmul.f32 1.442695, %v537_v42  ;;  %v441_v55 = vsub.f32 %v435_v51, %v440_v52 }
  0xcb   : > { %v528_v0 = vmul.f32 %v527_v58, %v1316_v4 }
  0xcc   : > { %876 = vpow2.f32 %v538_v48  ;;  %v442_v61 = vadd.f32 -4.5810614, %v441_v55 }
  0xcd   : > { %878 = vlog2.f32 %v520_v9  ;;  %v529_v10 = vadd.f32 %v528_v0, %v526_v63 }
  0xce   : > { %880 = vlog2.f32 %v532_v53 }
  0xd2   : > { %v877_v54 = vpop.eup %876 }
  0xd3   : > { %v879_v6 = vpop.eup %878  ;;  %v540_v59 = vmul.f32 %v877_v54, %v531_v49 }
  0xd4   : > { %v522_v62 = vmul.f32 0.6931472, %v879_v6  ;;  %v881_v2 = vpop.eup %880 }
  0xd5   : > { %v541_v60 = vadd.f32 %v540_v59, %v405_v44  ;;  %v534_v12 = vmul.f32 0.6931472, %v881_v2 }
  0xd6   : > { %v523_v5 = vadd.f32 %v522_v62, %v442_v61 }
  0xd7   : > { %v542_v1 = vadd.f32 1e-12, %v541_v60 }
  0xd8   : > { %v530_v11 = vadd.f32 %v529_v10, %v523_v5 }
  0xd9   : > { %882 = vlog2.f32 %v542_v1 }
  0xda   : > { %v535_v15 = vsub.f32 %v530_v11, %v534_v12 }
  0xdf   : > { %v883_v13 = vpop.eup %882 }
  0xe0   : > { %v544_v14 = vmul.f32 0.6931472, %v883_v13 }
  0xe2   : > { %v545_v16 = vsub.f32 0.0, %v544_v14 }
  0xe4   : > { %v547_v17 = vsel %vm546_vm0, %v545_v16, %v535_v15 }
  0xe5   : > { %549 = vst [vmem:[%s398_s1] sm:$0xff] %v547_v17 }
  0xe6   : > { %1031 = shalt.err (!%p1028_p13)
}
  0xe7   : > { %775 = dma.vmem_to_hbm [thread:$0]  (%p1212_p9), %s566_s11, 128, %s568_s23, %s551_s21  }
  0xe8 PF: > { %s1460_s12 = sld [smem:[#allocation19_spill]] }
  0xe9   : > { %s1461_s27 = sld [smem:[#allocation15_spill]] }
  0xee   : > { %p795_p0 = scmp.ge.s32.totalorder %s1460_s12, 2 }
  0xef   : > { %s579_s26 = sand.u32 1, %s1461_s27  }
  0xf0   : > { %p791_p1 = pnand %p795_p0, %p1218_p12  ;;  %s580_s16 = scalar_lea.sflag [#allocation4], %s579_s26 }
  0xf2   : > { %p792_p2 = pneg %p791_p1 }
  0xf4   : > { %1077 = dma.done.wait (%p792_p2), %s580_s16, 128  }
  0xf5   : > { %1079 = vsyncadd (%p792_p2), %s580_s16, 4294967168  ;;  %s27_s25 = sadd.s32 1, %s1460_s12   ;;  %s1463_s17 = sld [smem:[#allocation16_spill]] }
  0xf6   : > { %p24_p3 = scmp.ge.s32.totalorder %s27_s25, 6   ;;  %s1464_s20 = sld [smem:[#allocation23_spill]] }
  0xf7   : > { %s1465_s21 = sld [smem:[#allocation17_spill]]  ;;  %s1469_s18 = smov %s1086_s19 }
  0xf8   : > { %s1466_s22 = sld [smem:[#allocation18_spill]]  ;;  %26 = sbr.rel (!%p24_p3) target bundleno = 14 (0xe), region = 125 }
  0xf9   : > { %s1467_s23 = sld [smem:[#allocation20_spill]] }
  0xfa   : > { %s1468_s24 = sld [smem:[#allocation21_spill]] }
  0xfb   : > { %s1470_s19 = smov %s1463_s17 }
  0xfd   :  { %586 = vsyncpa [#allocation3], 1 }
  0xfe   :  { %588 = vsyncpa [#allocation3 + $0x1], 1 }
  0xff   :  { %589 = vsyncpa [#allocation6], 1 }
 0x100   :  { %591 = vsyncpa [#allocation6 + $0x1], 1 }
 0x101   :  { %592 = vsyncpa [#allocation9], 1 }
 0x102   :  { %594 = vsyncpa [#allocation9 + $0x1], 1 }
 0x103   :  { %595 = vsyncpa [#allocation4], 1 }
 0x104   :  { %597 = vsyncpa [#allocation4 + $0x1], 1 }

</bundles_post_ra>
